<compile_context>
chip_gen: v6e
topology: v6e:2x2x1
jax: 0.10.0
libtpu: 0.0.40
codegen_flags: <defaults>
</compile_context>

<pallas_src>
import jax
import jax.numpy as jnp
import numpy as np
from jax.experimental import pallas as pl
from jax.experimental.pallas import tpu as pltpu


# ----------------------------------------------------------------------------- tiling

def _round_up(x, m):
    return (x + m - 1) // m * m


def _pick_tiles(n):
    """Return (n_pad, tm, tk) for tiling the [N, N] adjacency."""
    if n <= 1024:
        # Single full-array block: always layout-legal, no padding, no per-step overhead.
        return n, n, n
    n_pad = _round_up(n, 512)
    tm = 512                                   # row tile (parallel axis), multiple of 256
    tk = 1024 if n_pad % 1024 == 0 else 512    # streamed reduction tile (bigger = better)
    return n_pad, tm, tk


# ----------------------------------------------------------------------------- kernels

def gin_layer_kernel(a_ref, x_ref, w_ref, b_ref, h_ref, acc_ref):
    """One GIN layer:  h[i-tile] = relu( (sum_k A_hat[i,k] @ x[k]) @ W + b ).

    a_ref: [tm, tk] bf16 adjacency tile (self-loop / (1+eps) folded into the diagonal)
    x_ref: [tk, Cin] bf16 node features for this reduction tile
    w_ref: [Cin, Cout] f32, b_ref: [1, Cout] f32
    h_ref: [tm, Cout] bf16 output tile
    acc_ref: [tm, Cin] f32 aggregation accumulator (VMEM scratch)
    """
    k = pl.program_id(1)

    @pl.when(k == 0)
    def _():
        acc_ref[...] = jnp.zeros_like(acc_ref)

    acc_ref[...] += jnp.dot(a_ref[...], x_ref[...],
                            preferred_element_type=jnp.float32)

    @pl.when(k == pl.num_programs(1) - 1)
    def _():
        h = jnp.dot(acc_ref[...], w_ref[...],
                    preferred_element_type=jnp.float32) + b_ref[...]
        h_ref[...] = jnp.maximum(h, 0.0).astype(h_ref.dtype)


def pool_head_kernel(p_ref, x_ref, wf_ref, bf_ref, out_ref, acc_ref):
    """Global mean pooling (as matmul) + final Linear, lane-dense output.

    p_ref:  [B, tk] f32 pooling-matrix tile, x_ref: [tk, C] bf16 node features
    wf_ref: [C, Cpad] f32 (padded to 128 lanes), bf_ref: [1, Cpad] f32
    out_ref: [B, Cpad] f32, acc_ref: [B, C] f32 pooled accumulator
    """
    k = pl.program_id(0)

    @pl.when(k == 0)
    def _():
        acc_ref[...] = jnp.zeros_like(acc_ref)

    acc_ref[...] += jnp.dot(p_ref[...], x_ref[...].astype(jnp.float32),
                            preferred_element_type=jnp.float32)

    @pl.when(k == pl.num_programs(0) - 1)
    def _():
        out_ref[...] = jnp.dot(acc_ref[...], wf_ref[...],
                               preferred_element_type=jnp.float32) + bf_ref[...]


# ----------------------------------------------------------------------------- wrappers

def _gin_layer(a, x, w, b, tm, tk):
    """pallas_call for one GIN layer.  a: [Np, Np] bf16, x: [Np, Cin] bf16."""
    n_pad = a.shape[0]
    cin = x.shape[1]
    cout = w.shape[1]
    ni, nk = n_pad // tm, n_pad // tk

    flops = int(2 * n_pad * n_pad * cin + 2 * n_pad * cin * cout)
    bytes_accessed = int(a.size * 2 + ni * x.size * 2 + n_pad * cout * 2
                         + (w.size + b.size) * 4)

    grid_spec = pltpu.PrefetchScalarGridSpec(
        num_scalar_prefetch=0,
        grid=(ni, nk),
        in_specs=[
            pl.BlockSpec((tm, tk), lambda i, k: (i, k)),      # A tile (streamed, bf16)
            pl.BlockSpec((tk, cin), lambda i, k: (k, 0)),     # x rows for this k tile
            pl.BlockSpec((cin, cout), lambda i, k: (0, 0)),   # W (small, constant block)
            pl.BlockSpec((1, cout), lambda i, k: (0, 0)),     # b
        ],
        out_specs=pl.BlockSpec((tm, cout), lambda i, k: (i, 0)),
        scratch_shapes=[pltpu.VMEM((tm, cin), jnp.float32)],
    )

    return pl.pallas_call(
        gin_layer_kernel,
        out_shape=jax.ShapeDtypeStruct((n_pad, cout), jnp.bfloat16),
        grid_spec=grid_spec,
        compiler_params=pltpu.CompilerParams(
            dimension_semantics=("parallel", "arbitrary"),
            vmem_limit_bytes=32 * 1024 * 1024,
        ),
        cost_estimate=pl.CostEstimate(flops=flops, transcendentals=0,
                                      bytes_accessed=bytes_accessed),
    )(a, x, w, b)


def _pool_head(p, x, wf_pad, bf_pad, tk):
    """Mean pooling + final Linear.  p: [B, Np] f32, x: [Np, C] bf16."""
    B, n_pad = p.shape
    c = x.shape[1]
    cpad = wf_pad.shape[1]
    nk = n_pad // tk

    grid_spec = pltpu.PrefetchScalarGridSpec(
        num_scalar_prefetch=0,
        grid=(nk,),
        in_specs=[
            pl.BlockSpec((B, tk), lambda k: (0, k)),
            pl.BlockSpec((tk, c), lambda k: (k, 0)),
            pl.BlockSpec((c, cpad), lambda k: (0, 0)),
            pl.BlockSpec((1, cpad), lambda k: (0, 0)),
        ],
        out_specs=pl.BlockSpec((B, cpad), lambda k: (0, 0)),
        scratch_shapes=[pltpu.VMEM((B, c), jnp.float32)],
    )

    return pl.pallas_call(
        pool_head_kernel,
        out_shape=jax.ShapeDtypeStruct((B, cpad), jnp.float32),
        grid_spec=grid_spec,
        compiler_params=pltpu.CompilerParams(
            dimension_semantics=("arbitrary",),
            vmem_limit_bytes=32 * 1024 * 1024,
        ),
    )(p, x, wf_pad, bf_pad)


def gin_forward(x, edge_index, batch, num_graphs, params):
    """JAX glue: densify + pad the graph structure, then three tiled pallas_calls."""
    N = x.shape[0]
    B = num_graphs
    n_pad, tm, tk = _pick_tiles(N)

    # GINConv self-term folded into the adjacency diagonal.  trainable_eps=False =>
    # both layers use the fixed default eps = 0, so one A_hat serves both layers.
    eps = params.get("eps", (0.0, 0.0))
    assert float(eps[0]) == float(eps[1]), "single-A_hat eps fold requires equal per-layer eps"

    src, dst = edge_index[0], edge_index[1]
    a = jnp.zeros((n_pad, n_pad), jnp.float32).at[dst, src].add(1.0)   # A[i, j]: edge j -> i
    diag = jnp.arange(N)
    a = a.at[diag, diag].add(1.0 + float(eps[0]))
    a = a.astype(jnp.bfloat16)   # degree counts are small integers -> exact in bf16
    # TODO(synk): replace the dense O(N^2) adjacency with CSR / padded neighbor lists +
    #             scalar-prefetch gather-aggregate for large sparse graphs.

    # Mean-pooling matrix P[b, n] = 1{batch[n]==b} / count_b, zero-padded columns.
    onehot = (batch[None, :] == jnp.arange(B)[:, None]).astype(jnp.float32)
    counts = jnp.maximum(onehot.sum(axis=1, keepdims=True), 1.0)
    p = jnp.pad(onehot / counts, ((0, 0), (0, n_pad - N)))

    x_pad = jnp.pad(x, ((0, n_pad - N), (0, 0))).astype(jnp.bfloat16)

    # Two GIN layers (each streams A once; intermediate [Np, 32] is bf16).
    h1 = _gin_layer(a, x_pad, params["w1"], params["b1"], tm, tk)
    h2 = _gin_layer(a, h1, params["w2"], params["b2"], tm, tk)

    # Lane-dense head: pad final Linear to 128 output lanes, slice back afterwards.
    out_channels = params["wf"].shape[1]
    c_lane = _round_up(out_channels, 128)
    wf_pad = jnp.pad(params["wf"], ((0, 0), (0, c_lane - out_channels)))
    bf_pad = jnp.pad(params["bf"], ((0, 0), (0, c_lane - out_channels)))

    out_pad = _pool_head(p, h2, wf_pad, bf_pad, tk)
    return out_pad[:, :out_channels]


def gin_reference(x, edge_index, batch, num_graphs, params):
    """Plain-JAX f32 reference (true module semantics) for validation."""
    N = x.shape[0]
    B = num_graphs
    src, dst = edge_index[0], edge_index[1]
    a = jnp.zeros((N, N), jnp.float32).at[dst, src].add(1.0)
    onehot = (batch[None, :] == jnp.arange(B)[:, None]).astype(jnp.float32)
    counts = jnp.maximum(onehot.sum(axis=1, keepdims=True), 1.0)
    p = onehot / counts
    eps = params["eps"]
    h = (1.0 + eps[0]) * x + a @ x
    x = jnp.maximum(h @ params["w1"] + params["b1"], 0.0)
    h = (1.0 + eps[1]) * x + a @ x
    x = jnp.maximum(h @ params["w2"] + params["b2"], 0.0)
    return (p @ x) @ params["wf"] + params["bf"]


def ring_graph_batch(num_graphs, nodes_per_graph):
    """Bidirectional ring graphs, `num_graphs` graphs of `nodes_per_graph` nodes each."""
    src, dst = [], []
    for g in range(num_graphs):
        base = g * nodes_per_graph
        for i in range(nodes_per_graph):
            u, v = base + i, base + (i + 1) % nodes_per_graph
            src += [u, v]
            dst += [v, u]
    edge_index = jnp.array([src, dst], dtype=jnp.int32)
    batch = jnp.array([g for g in range(num_graphs) for _ in range(nodes_per_graph)],
                      dtype=jnp.int32)
    return edge_index, batch


if __name__ == "__main__":
    in_channels = 8
    dims = [32, 32]
    out_channels = 4

    key = jax.random.PRNGKey(0)
    k_x, k_w1, k_b1, k_w2, k_b2, k_wf, k_bf = jax.random.split(key, 7)

    params = {
        "w1": 0.1 * jax.random.normal(k_w1, (in_channels, dims[0]), jnp.float32),
        "b1": 0.1 * jax.random.normal(k_b1, (1, dims[0]), jnp.float32),
        "w2": 0.1 * jax.random.normal(k_w2, (dims[0], dims[1]), jnp.float32),
        "b2": 0.1 * jax.random.normal(k_b2, (1, dims[1]), jnp.float32),
        "wf": 0.1 * jax.random.normal(k_wf, (dims[1], out_channels), jnp.float32),
        "bf": 0.1 * jax.random.normal(k_bf, (1, out_channels), jnp.float32),
        # trainable_eps=False -> eps fixed at 0 per layer (GINConv default).
        "eps": (0.0, 0.0),
    }

    # Case 1: tiny (2 graphs x 8 nodes)   -> single-block path, no padding.
    # Case 2: 2 graphs x 512 nodes (1024) -> largest single-block path.
    # Case 3: 3 graphs x 512 nodes (1536) -> exercises the tiled / gridded accumulation path.
    for num_graphs, nodes_per_graph in [(2, 8), (2, 512), (3, 512)]:
        N = num_graphs * nodes_per_graph
        edge_index, batch = ring_graph_batch(num_graphs, nodes_per_graph)
        x = jax.random.normal(k_x, (N, in_channels), jnp.float32)

        out = gin_forward(x, edge_index, batch, num_graphs, params)
        out = jax.block_until_ready(out)

        ref = gin_reference(x, edge_index, batch, num_graphs, params)
        # bf16 A / activations with f32 accumulation -> ~1% relative error vs f32 ref.
        np.testing.assert_allclose(np.asarray(out), np.asarray(ref),
                                   rtol=5e-2, atol=2e-2)
        assert out.shape == (num_graphs, out_channels)

    print("KERNEL_OK")
</pallas_src>

<mosaic_0001>
module attributes {stable_mosaic.version = 11 : i64} {
  func.func @gin_layer_kernel(%arg0: i32, %arg1: i32, %arg2: memref<16x16xbf16, #tpu.memory_space<vmem>>, %arg3: memref<16x8xbf16, #tpu.memory_space<vmem>>, %arg4: memref<8x32xf32, #tpu.memory_space<vmem>>, %arg5: memref<1x32xf32, #tpu.memory_space<vmem>>, %arg6: memref<16x32xbf16, #tpu.memory_space<vmem>>, %arg7: memref<16x8xf32, #tpu.memory_space<vmem>>) attributes {dimension_semantics = [#tpu.dimension_semantics<parallel>, #tpu.dimension_semantics<arbitrary>], iteration_bounds = array<i64: 1, 1>, scalar_prefetch = 0 : i64, scratch_operands = 1 : i64, tpu.core_type = #tpu.core_type<tc>, window_params = [{transform_indices = @transform_0, window_bounds = array<i64: 16, 16>}, {transform_indices = @transform_1, window_bounds = array<i64: 16, 8>}, {pipeline_mode = #tpu.pipeline_mode<synchronous>, transform_indices = @transform_2, window_bounds = array<i64: 8, 32>}, {pipeline_mode = #tpu.pipeline_mode<synchronous>, transform_indices = @transform_3, window_bounds = array<i64: 1, 32>}, {transform_indices = @transform_4, window_bounds = array<i64: 16, 32>}]} {
    %c0_i32 = arith.constant 0 : i32
    %0 = arith.cmpi eq, %arg1, %c0_i32 : i32
    %1 = arith.extui %0 : i1 to i32
    %c0_i32_0 = arith.constant 0 : i32
    %2 = arith.cmpi ne, %1, %c0_i32_0 : i32
    scf.if %2 {
      %cst_10 = arith.constant 0.000000e+00 : f32
      %12 = vector.broadcast %cst_10 : f32 to vector<16x8xf32>
      %c0_11 = arith.constant 0 : index
      %c0_12 = arith.constant 0 : index
      %13 = vector.load %arg7[%c0_11, %c0_12] : memref<16x8xf32, #tpu.memory_space<vmem>>, vector<16x8xf32>
      tpu.vector_store %arg7[%c0_11, %c0_12], %12 {strides = array<i32>} : memref<16x8xf32, #tpu.memory_space<vmem>>, vector<16x8xf32>,
    } else {
    }
    %c0 = arith.constant 0 : index
    %c0_1 = arith.constant 0 : index
    %3 = vector.load %arg7[%c0, %c0_1] : memref<16x8xf32, #tpu.memory_space<vmem>>, vector<16x8xf32>
    %c0_2 = arith.constant 0 : index
    %c0_3 = arith.constant 0 : index
    %4 = vector.load %arg2[%c0_2, %c0_3] : memref<16x16xbf16, #tpu.memory_space<vmem>>, vector<16x16xbf16>
    %c0_4 = arith.constant 0 : index
    %c0_5 = arith.constant 0 : index
    %5 = vector.load %arg3[%c0_4, %c0_5] : memref<16x8xbf16, #tpu.memory_space<vmem>>, vector<16x8xbf16>
    %cst = arith.constant dense<0.000000e+00> : vector<16x8xf32>
    %6 = tpu.matmul %4, %5, %cst {dimension_numbers = #tpu.dot_dimension_numbers<[1], [0], [0], [1], [0, 0, 1, 1], [], []>} : vector<16x16xbf16>, vector<16x8xbf16>, vector<16x8xf32> -> vector<16x8xf32>
    %7 = arith.addf %3, %6 : vector<16x8xf32>
    %c0_6 = arith.constant 0 : index
    %c0_7 = arith.constant 0 : index
    %8 = vector.load %arg7[%c0_6, %c0_7] : memref<16x8xf32, #tpu.memory_space<vmem>>, vector<16x8xf32>
    tpu.vector_store %arg7[%c0_6, %c0_7], %7 {strides = array<i32>} : memref<16x8xf32, #tpu.memory_space<vmem>>, vector<16x8xf32>,
    %c0_i32_8 = arith.constant 0 : i32
    %9 = arith.cmpi eq, %arg1, %c0_i32_8 : i32
    %10 = arith.extui %9 : i1 to i32
    %c0_i32_9 = arith.constant 0 : i32
    %11 = arith.cmpi ne, %10, %c0_i32_9 : i32
    scf.if %11 {
      %c0_10 = arith.constant 0 : index
      %c0_11 = arith.constant 0 : index
      %12 = vector.load %arg7[%c0_10, %c0_11] : memref<16x8xf32, #tpu.memory_space<vmem>>, vector<16x8xf32>
      %c0_12 = arith.constant 0 : index
      %c0_13 = arith.constant 0 : index
      %13 = vector.load %arg4[%c0_12, %c0_13] : memref<8x32xf32, #tpu.memory_space<vmem>>, vector<8x32xf32>
      %cst_14 = arith.constant dense<0.000000e+00> : vector<16x32xf32>
      %14 = tpu.matmul %12, %13, %cst_14 {dimension_numbers = #tpu.dot_dimension_numbers<[1], [0], [0], [1], [0, 0, 1, 1], [], []>} : vector<16x8xf32>, vector<8x32xf32>, vector<16x32xf32> -> vector<16x32xf32>
      %c0_15 = arith.constant 0 : index
      %c0_16 = arith.constant 0 : index
      %15 = vector.load %arg5[%c0_15, %c0_16] : memref<1x32xf32, #tpu.memory_space<vmem>>, vector<1x32xf32>
      %16 = vector.broadcast %15 : vector<1x32xf32> to vector<16x32xf32>
      %17 = arith.addf %14, %16 : vector<16x32xf32>
      %cst_17 = arith.constant 0.000000e+00 : f32
      %18 = vector.broadcast %cst_17 : f32 to vector<16x32xf32>
      %19 = arith.maximumf %17, %18 : vector<16x32xf32>
      %20 = arith.truncf %19 : vector<16x32xf32> to vector<16x32xbf16>
      %c0_18 = arith.constant 0 : index
      %c0_19 = arith.constant 0 : index
      %21 = vector.load %arg6[%c0_18, %c0_19] : memref<16x32xbf16, #tpu.memory_space<vmem>>, vector<16x32xbf16>
      tpu.vector_store %arg6[%c0_18, %c0_19], %20 {strides = array<i32>} : memref<16x32xbf16, #tpu.memory_space<vmem>>, vector<16x32xbf16>,
    } else {
    }
    return
  }
  func.func @transform_0(%arg0: i32, %arg1: i32) -> (i32, i32) {
    %c0_i32 = arith.constant 0 : i32
    return %arg0, %arg1 : i32, i32
  }
  func.func @transform_1(%arg0: i32, %arg1: i32) -> (i32, i32) {
    %c0_i32 = arith.constant 0 : i32
    %c0_i32_0 = arith.constant 0 : i32
    return %arg1, %c0_i32 : i32, i32
  }
  func.func @transform_2(%arg0: i32, %arg1: i32) -> (i32, i32) {
    %c0_i32 = arith.constant 0 : i32
    %c0_i32_0 = arith.constant 0 : i32
    %c0_i32_1 = arith.constant 0 : i32
    return %c0_i32, %c0_i32_0 : i32, i32
  }
  func.func @transform_3(%arg0: i32, %arg1: i32) -> (i32, i32) {
    %c0_i32 = arith.constant 0 : i32
    %c0_i32_0 = arith.constant 0 : i32
    %c0_i32_1 = arith.constant 0 : i32
    return %c0_i32, %c0_i32_0 : i32, i32
  }
  func.func @transform_4(%arg0: i32, %arg1: i32) -> (i32, i32) {
    %c0_i32 = arith.constant 0 : i32
    %c0_i32_0 = arith.constant 0 : i32
    return %arg0, %c0_i32 : i32, i32
  }
}

</mosaic_0001>

<bundles_post_ra>
// kernel: tpu_custom_call.1
= control target key start
LH: loop header
LB: loop body
LE: loop exit
PB: predicated region body
PF: predicated region fallthrough
CT: control target
= control target key end

     0   :  { %9 = vsyncpa [#allocation4], 0  ;;  %s359_s0 = inlined_call_operand.vmem [shape: bf16[16,16], index: 0, kind: input, shape index: {}]   ;;  %s360_s1 = inlined_call_operand.vmem [shape: bf16[16,8], index: 1, kind: input, shape index: {}]   ;;  %s361_s2 = inlined_call_operand.hbm [shape: f32[8,32], index: 2, kind: input, shape index: {}]   ;;  %s362_s3 = inlined_call_operand.vmem [shape: f32[1,32], index: 3, kind: input, shape index: {}]   ;;  %s363_s4 = inlined_call_operand.hbm [shape: bf16[16,32], index: 4, kind: output, shape index: {}]  }
   0x1   :  { %10 = vsyncpa [#allocation5], 0  ;;  %s307_s15 = smov [#allocation3]  }
   0x2   :  { %s21_s16 = sshll.u32 %s307_s15, 4  ;;  %s22_s16 = int_to_ptr.vmem [resolvable:$true] %s21_s16 }
   0x3   :  { %s271_s17 = scalar_lea.vmem %s22_s16, 128  ;;  %p276_p1 = scmp.lt.s32.totalorder %s22_s16, %s22_s16 }
   0x4   :  { %p272_p0 = scmp.ne.s32.totalorder %s22_s16, %s271_s17  ;;  %p277_p2 = scmp.lt.s32.totalorder %s271_s17, %s271_s17 }
   0x6   :  { %p278_p3 = por %p277_p2, %p276_p1 }
   0x8   :  { %p279_p4 = pnand %p278_p3, %p272_p0 }
   0xa   :  { %282 = shalt.err (!%p279_p4)
}
   0xb   :  { %24 = dma.hbm_to_vmem [thread:$0]  %s361_s2, 128, %s22_s16, [#allocation4]  }
   0xc   :  { %303 = dma.done.wait [#allocation4], 128  }
   0xd   :  { %304 = vsyncadd [#allocation4], 4294967168  ;;  %vm35_vm0 = vcmask 64512   ;;  %v308_v0 = vmov 0.0   ;;  %vm309_vm1 = vmmov 0   ;;  %v261_v1 = vld [vmem:[%s360_s1] sm:$0xff]  }
   0xe   :  { %36 = vst.msk [vmem:[#allocation2] sm:$0xff] %vm35_vm0, %v308_v0  ;;  %37 = vst.msk [vmem:[#allocation2 + $0x8] sm:$0xff] %vm35_vm0, %v308_v0  ;;  %244 = vmatprep.subr.bf16.mxu0 %v308_v0  ;;  %246 = vmatprep.mubr.msk.bf16.mxu0 %vm309_vm1, %v308_v0  ;;  %v262_v2 = vld [vmem:[%s359_s0] sm:$0xff]   ;;  %vm55_vm2 = vcmask 130048   ;;  %v110_v3 = vld [vmem:[#allocation3] sm:$0xff]  ;;  %s310_s2 = smov [#allocation6]  }
   0xf   :  { %245 = vmatpush3.bf16.msra.mxu0 %v261_v1  ;;  %250 = vmatprep.subr.mxu1 %v110_v3  ;;  %v232_v14 = vld [vmem:[%s362_s3] ss:$0 sm:$0xff]  ;;  %s217_s24 = sshll.u32 %s310_s2, 4  ;;  %vm209_vm3 = vcmask 257024   ;;  %s218_s24 = int_to_ptr.vmem [resolvable:$true] %s217_s24 }
  0x10   :  { %251 = vmatpush3.msra.mxu1 %v110_v3  ;;  %s283_s25 = scalar_lea.vmem %s218_s24, 128  ;;  %p288_p6 = scmp.lt.s32.totalorder %s218_s24, %s218_s24 }
  0x11   :  { %p284_p5 = scmp.ne.s32.totalorder %s218_s24, %s283_s25  ;;  %p289_p7 = scmp.lt.s32.totalorder %s283_s25, %s283_s25 }
  0x12   :  { %247 = vmatmul.mubr.msk.bf16.vlgmr.msra.gmra.mxu0 %vm55_vm2, %v262_v2 }
  0x13   :  { %p290_p8 = por %p289_p7, %p288_p6 }
  0x15   :  { %v38_v4 = vld [vmem:[#allocation2] sm:$0xff]  ;;  %v39_v8 = vld [vmem:[#allocation2 + $0x8] sm:$0xff]  ;;  %p291_p9 = pnand %p290_p8, %p284_p5 }
  0xd2   :  { %v93_v5 = vpop.f32.mrf.mxu0 }
  0xd3   :  { %v100_v6 = vadd.f32 %v93_v5, %v38_v4 }
  0xd4   :  { %v248_v7 = vpop.f32.mrf.mxu0 }
  0xd5   :  { %103 = vst.msk [vmem:[#allocation2] sm:$0xff] %vm35_vm0, %v100_v6 }
  0xd6   :  { %v96_v9 = vpop.f32.mrf.mxu0 }
  0xd7   :  { %v101_v10 = vadd.f32 %v96_v9, %v39_v8 }
  0xd8   :  { %v249_v11 = vpop.f32.mrf.mxu0 }
  0xd9   :  { %104 = vst.msk [vmem:[#allocation2 + $0x8] sm:$0xff] %vm35_vm0, %v101_v10 }
  0xdc   :  { %v108_v12 = vld [vmem:[#allocation2] sm:$0xff] }
  0xdd   :  { %252 = vmatprep.mubr.msk.f32.mxu1 %vm35_vm0, %v108_v12 }
  0xe0   :  { %v109_v13 = vld [vmem:[#allocation2 + $0x8] sm:$0xff] }
  0xe1   :  { %253 = vmatmul.mubr.msk.f32.vlgmr.msra.gmra.mxu1 %vm35_vm0, %v109_v13 }
 0x1a1   :  { %v254_v15 = vpop.f32.mrf.mxu1 }
 0x1a2   :  { %v196_v16 = vadd.f32 %v254_v15, %v232_v14 }
 0x1a3   :  { %v190_v17 = vpop.f32.mrf.mxu1 }
 0x1a4   :  { %v200_v18 = vmax.f32 %v196_v16, 0.0  ;;  %v191_v19 = vadd.f32 %v232_v14, %v190_v17 }
 0x1a6   :  { %v238_v20 = vpack.c.bf16 %v200_v18, %v200_v18  ;;  %v199_v21 = vmax.f32 %v191_v19, 0.0 }
 0x1a8   :  { %211 = vst.msk [vmem:[#allocation6 + $0x4] sm:$0xf] %vm209_vm3, %v238_v20  ;;  %v237_v22 = vpack.c.bf16 %v199_v21, %v199_v21 }
 0x1aa   :  { %210 = vst.msk [vmem:[#allocation6] sm:$0xf] %vm209_vm3, %v237_v22 }
 0x1ab   :  { %294 = shalt.err (!%p291_p9)
}
 0x1ac   :  { %s311_s3 = smov 64   ;;  %s312_s26 = smov 4  }
 0x1ad   :  { %223 = dma.vmem_to_hbm [thread:$0]  %s218_s24, 128, %s363_s4, [#allocation5], %s311_s3, %s311_s3, %s312_s26  }
 0x1ae   :  { %305 = dma.done.wait [#allocation5], 128  }
 0x1af   :  { %306 = vsyncadd [#allocation5], 4294967168 }
 0x1b0   :  { %227 = vsyncpa [#allocation4], 1 }
 0x1b1   :  { %228 = vsyncpa [#allocation5], 1 }

</bundles_post_ra>
